<compile_context>
chip_gen: v5e
topology: v5e:2x2
jax: 0.10.0
libtpu: 0.0.40
codegen_flags: <defaults>
</compile_context>

<pallas_src>
import jax
import jax.numpy as jnp
from jax.experimental import pallas as pl
from jax.experimental.pallas import tpu as pltpu

HIDDEN = 64
H2 = 2 * HIDDEN  # 128 fused lanes (actor 0..63, critic 64..127)


def _round_up(x, m):
    return (x + m - 1) // m * m


def _choose_tile(b8, tb_max):
    """Largest multiple-of-8 divisor of b8 that is <= tb_max.

    Prefers a tile that leaves >= 2 grid steps so the batch can be sharded
    across v7x's two TensorCores.  b8 is always a multiple of 8, so 8 always
    divides and there is never any tile padding (zero wasted DMA/MXU work).
    """
    divisors = [d for d in range(8, min(tb_max, b8) + 1, 8) if b8 % d == 0]
    if not divisors:
        return min(tb_max, b8)  # unreachable for b8 % 8 == 0
    two_step = [d for d in divisors if b8 // d >= 2]
    return max(two_step) if two_step else max(divisors)


def _make_kernel(obs_dim, obs_pad, h2):
    lane_pad = obs_pad - obs_dim

    def kernel(obs_ref, w_ref, b_ref, out_ref):
        x = obs_ref[...]                                 # [TB, obs_dim] f32
        if lane_pad:
            # VMEM-only lane pad (the matching weight rows are zero, so the
            # pad values are irrelevant for correctness; zeros are cheapest).
            x = jnp.pad(x, ((0, 0), (0, lane_pad)))      # [TB, obs_pad]

        w1 = w_ref[0:obs_pad, :]                         # [128, 128] bf16
        w2 = w_ref[obs_pad:obs_pad + h2, :]              # [128, 128] bf16
        w3 = w_ref[obs_pad + h2:obs_pad + 2 * h2, :]     # [128, 128] bf16
        b = b_ref[...]                                   # [8, 128] f32 (rows 0..2)

        # bf16 MXU operands, f32 accumulation; bias add + tanh in f32.
        h = jnp.tanh(jnp.dot(x.astype(jnp.bfloat16), w1,
                             preferred_element_type=jnp.float32) + b[0:1, :])
        h = jnp.tanh(jnp.dot(h.astype(jnp.bfloat16), w2,
                             preferred_element_type=jnp.float32) + b[1:2, :])
        out_ref[...] = (jnp.dot(h.astype(jnp.bfloat16), w3,
                                preferred_element_type=jnp.float32)
                        + b[2:3, :]).astype(out_ref.dtype)
    return kernel


def init_params(key, obs_dim, act_dim, hidden=HIDDEN):
    """PyTorch nn.Linear-style init; weights stored [in, out], biases [1, out]."""
    def linear(k, fan_in, fan_out):
        kw, kb = jax.random.split(k)
        bound = 1.0 / jnp.sqrt(jnp.float32(fan_in))
        w = jax.random.uniform(kw, (fan_in, fan_out), jnp.float32, -bound, bound)
        b = jax.random.uniform(kb, (1, fan_out), jnp.float32, -bound, bound)
        return w, b

    keys = jax.random.split(key, 6)
    aw1, ab1 = linear(keys[0], obs_dim, hidden)
    aw2, ab2 = linear(keys[1], hidden, hidden)
    aw3, ab3 = linear(keys[2], hidden, act_dim)
    cw1, cb1 = linear(keys[3], obs_dim, hidden)
    cw2, cb2 = linear(keys[4], hidden, hidden)
    cw3, cb3 = linear(keys[5], hidden, 1)
    return dict(aw1=aw1, ab1=ab1, aw2=aw2, ab2=ab2, aw3=aw3, ab3=ab3,
                cw1=cw1, cb1=cb1, cw2=cw2, cb2=cb2, cw3=cw3, cb3=cb3)


def pack_params(p, obs_dim, act_dim, hidden=HIDDEN, w_dtype=jnp.bfloat16):
    """Pack 12 tensors into one bf16 weight slab + one f32 bias slab (done once)."""
    h2 = 2 * hidden
    assert act_dim + 1 <= h2, "actor logits + critic value must fit in fused lanes"
    obs_pad = _round_up(obs_dim, 128)   # 128-aligned rows => clean slab slices
    assert obs_dim <= obs_pad

    # layer 1: [aw1 | cw1], zero-padded obs rows
    w1 = jnp.zeros((obs_pad, h2), jnp.float32)
    w1 = w1.at[:obs_dim, :hidden].set(p["aw1"]).at[:obs_dim, hidden:].set(p["cw1"])
    # layer 2: block_diag(aw2, cw2)
    w2 = jnp.zeros((h2, h2), jnp.float32)
    w2 = w2.at[:hidden, :hidden].set(p["aw2"]).at[hidden:, hidden:].set(p["cw2"])
    # layer 3: actor -> lanes [0, act_dim), critic -> lane act_dim, rest zero
    w3 = jnp.zeros((h2, h2), jnp.float32)
    w3 = w3.at[:hidden, :act_dim].set(p["aw3"])
    w3 = w3.at[hidden:, act_dim:act_dim + 1].set(p["cw3"])

    w_slab = jnp.concatenate([w1, w2, w3], axis=0).astype(w_dtype)  # [obs_pad+256, 128]

    b_slab = jnp.zeros((8, h2), jnp.float32)
    b_slab = b_slab.at[0, :hidden].set(p["ab1"][0]).at[0, hidden:].set(p["cb1"][0])
    b_slab = b_slab.at[1, :hidden].set(p["ab2"][0]).at[1, hidden:].set(p["cb2"][0])
    b_slab = b_slab.at[2, :act_dim].set(p["ab3"][0]).at[2, act_dim].set(p["cb3"][0, 0])
    return w_slab, b_slab, obs_pad


def actor_critic_forward(obs, w_slab, b_slab, obs_pad, act_dim,
                         hidden=HIDDEN, tb=1024):
    """obs: [B, obs_dim] f32 -> (actor [B, act_dim] f32, critic [B, 1] f32)."""
    B, obs_dim = obs.shape
    h2 = 2 * hidden
    assert obs_dim <= obs_pad
    assert w_slab.shape == (obs_pad + 2 * h2, h2)

    B8 = _round_up(B, 8)
    TB = _choose_tile(B8, tb)
    grid = (B8 // TB,)

    # Sublane/row padding only (<= 7 rows); no lane pad in HBM — that happens
    # in VMEM inside the kernel.
    obs_in = obs if B == B8 else jnp.pad(obs, ((0, B8 - B), (0, 0)))

    kernel = _make_kernel(obs_dim, obs_pad, h2)
    out = pl.pallas_call(
        kernel,
        out_shape=jax.ShapeDtypeStruct((B8, h2), jnp.float32),
        grid=grid,
        in_specs=[
            # batch-tiled obs, last dim = full array dim (no (8,128) issue)
            pl.BlockSpec((TB, obs_dim), lambda i: (i, 0)),
            # constant weight/bias slabs: single-buffered (no wasted 2nd copy)
            pl.BlockSpec(w_slab.shape, lambda i: (0, 0),
                         pipeline_mode=pl.Buffered(1)),
            pl.BlockSpec(b_slab.shape, lambda i: (0, 0),
                         pipeline_mode=pl.Buffered(1)),
        ],
        out_specs=pl.BlockSpec((TB, h2), lambda i: (i, 0)),   # lane-dense slab
        compiler_params=pltpu.CompilerParams(
            dimension_semantics=("parallel",)),
    )(obs_in, w_slab, b_slab)

    actor = out[:B, :act_dim]
    critic = out[:B, act_dim:act_dim + 1]
    return actor, critic


def reference_forward(obs, p):
    h = jnp.tanh(obs @ p["aw1"] + p["ab1"])
    h = jnp.tanh(h @ p["aw2"] + p["ab2"])
    a = h @ p["aw3"] + p["ab3"]
    c = jnp.tanh(obs @ p["cw1"] + p["cb1"])
    c = jnp.tanh(c @ p["cw2"] + p["cb2"])
    v = c @ p["cw3"] + p["cb3"]
    return a, v


if __name__ == "__main__":
    # Ant-v5-like dims (obs_dim=105, act_dim=8), small batch, deterministic.
    B, OBS_DIM, ACT_DIM = 8, 105, 8

    key = jax.random.PRNGKey(0)
    k_obs, k_params = jax.random.split(key)
    obs = jax.random.normal(k_obs, (B, OBS_DIM), jnp.float32)
    params = init_params(k_params, OBS_DIM, ACT_DIM, HIDDEN)

    # pack once (wrapper/init-time), not inside the kernel
    w_slab, b_slab, obs_pad = pack_params(params, OBS_DIM, ACT_DIM, HIDDEN)

    actor_out, critic_out = actor_critic_forward(
        obs, w_slab, b_slab, obs_pad, ACT_DIM, HIDDEN)
    actor_out = jax.block_until_ready(actor_out)
    critic_out = jax.block_until_ready(critic_out)

    # sanity check vs. plain-JAX f32 reference (bf16 MXU operands -> loosened tol)
    a_ref, v_ref = reference_forward(obs, params)
    assert actor_out.shape == (B, ACT_DIM)
    assert critic_out.shape == (B, 1)
    assert jnp.allclose(actor_out, a_ref, atol=2e-2, rtol=2e-2)
    assert jnp.allclose(critic_out, v_ref, atol=2e-2, rtol=2e-2)

    print("KERNEL_OK")
</pallas_src>

<mosaic_0001>
module attributes {stable_mosaic.version = 11 : i64} {
  func.func @kernel(%arg0: i32, %arg1: memref<8x105xf32, #tpu.memory_space<vmem>>, %arg2: memref<384x128xbf16, #tpu.memory_space<vmem>>, %arg3: memref<8x128xf32, #tpu.memory_space<vmem>>, %arg4: memref<8x128xf32, #tpu.memory_space<vmem>>) attributes {dimension_semantics = [#tpu.dimension_semantics<parallel>], iteration_bounds = array<i64: 1>, scalar_prefetch = 0 : i64, scratch_operands = 0 : i64, tpu.core_type = #tpu.core_type<tc>, window_params = [{transform_indices = @transform_0, window_bounds = array<i64: 8, 105>}, {pipeline_mode = #tpu.pipeline_mode<synchronous>, transform_indices = @transform_1, window_bounds = array<i64: 384, 128>}, {pipeline_mode = #tpu.pipeline_mode<synchronous>, transform_indices = @transform_2, window_bounds = array<i64: 8, 128>}, {transform_indices = @transform_3, window_bounds = array<i64: 8, 128>}]} {
    %c0 = arith.constant 0 : index
    %c0_0 = arith.constant 0 : index
    %0 = vector.load %arg1[%c0, %c0_0] : memref<8x105xf32, #tpu.memory_space<vmem>>, vector<8x105xf32>
    %c0_i32 = arith.constant 0 : i32
    %1 = arith.sitofp %c0_i32 : i32 to f32
    %2 = vector.broadcast %1 : f32 to vector<8x23xf32>
    %3 = tpu.concatenate %0, %2 in 1 : vector<8x105xf32>, vector<8x23xf32> -> vector<8x128xf32>
    %c0_1 = arith.constant 0 : index
    %c0_2 = arith.constant 0 : index
    %4 = vector.load %arg2[%c0_1, %c0_2] : memref<384x128xbf16, #tpu.memory_space<vmem>>, vector<128x128xbf16>
    %c128 = arith.constant 128 : index
    %c0_3 = arith.constant 0 : index
    %5 = vector.load %arg2[%c128, %c0_3] : memref<384x128xbf16, #tpu.memory_space<vmem>>, vector<128x128xbf16>
    %c256 = arith.constant 256 : index
    %c0_4 = arith.constant 0 : index
    %6 = vector.load %arg2[%c256, %c0_4] : memref<384x128xbf16, #tpu.memory_space<vmem>>, vector<128x128xbf16>
    %c0_5 = arith.constant 0 : index
    %c0_6 = arith.constant 0 : index
    %7 = vector.load %arg3[%c0_5, %c0_6] : memref<8x128xf32, #tpu.memory_space<vmem>>, vector<8x128xf32>
    %8 = arith.truncf %3 : vector<8x128xf32> to vector<8x128xbf16>
    %cst = arith.constant dense<0.000000e+00> : vector<8x128xf32>
    %9 = tpu.matmul %8, %4, %cst {dimension_numbers = #tpu.dot_dimension_numbers<[1], [0], [0], [1], [0, 0, 1, 1], [], []>} : vector<8x128xbf16>, vector<128x128xbf16>, vector<8x128xf32> -> vector<8x128xf32>
    %10 = vector.extract_strided_slice %7 {offsets = [0, 0], sizes = [1, 128], strides = [1, 1]} : vector<8x128xf32> to vector<1x128xf32>
    %11 = vector.broadcast %10 : vector<1x128xf32> to vector<8x128xf32>
    %12 = arith.addf %9, %11 : vector<8x128xf32>
    %13 = math.tanh %12 : vector<8x128xf32>
    %14 = arith.truncf %13 : vector<8x128xf32> to vector<8x128xbf16>
    %cst_7 = arith.constant dense<0.000000e+00> : vector<8x128xf32>
    %15 = tpu.matmul %14, %5, %cst_7 {dimension_numbers = #tpu.dot_dimension_numbers<[1], [0], [0], [1], [0, 0, 1, 1], [], []>} : vector<8x128xbf16>, vector<128x128xbf16>, vector<8x128xf32> -> vector<8x128xf32>
    %16 = vector.extract_strided_slice %7 {offsets = [1, 0], sizes = [1, 128], strides = [1, 1]} : vector<8x128xf32> to vector<1x128xf32>
    %17 = vector.broadcast %16 : vector<1x128xf32> to vector<8x128xf32>
    %18 = arith.addf %15, %17 : vector<8x128xf32>
    %19 = math.tanh %18 : vector<8x128xf32>
    %20 = arith.truncf %19 : vector<8x128xf32> to vector<8x128xbf16>
    %cst_8 = arith.constant dense<0.000000e+00> : vector<8x128xf32>
    %21 = tpu.matmul %20, %6, %cst_8 {dimension_numbers = #tpu.dot_dimension_numbers<[1], [0], [0], [1], [0, 0, 1, 1], [], []>} : vector<8x128xbf16>, vector<128x128xbf16>, vector<8x128xf32> -> vector<8x128xf32>
    %22 = vector.extract_strided_slice %7 {offsets = [2, 0], sizes = [1, 128], strides = [1, 1]} : vector<8x128xf32> to vector<1x128xf32>
    %23 = vector.broadcast %22 : vector<1x128xf32> to vector<8x128xf32>
    %24 = arith.addf %21, %23 : vector<8x128xf32>
    %c0_9 = arith.constant 0 : index
    %c0_10 = arith.constant 0 : index
    %25 = vector.load %arg4[%c0_9, %c0_10] : memref<8x128xf32, #tpu.memory_space<vmem>>, vector<8x128xf32>
    tpu.vector_store %arg4[%c0_9, %c0_10], %24 {strides = array<i32>} : memref<8x128xf32, #tpu.memory_space<vmem>>, vector<8x128xf32>,
    return
  }
  func.func @transform_0(%arg0: i32) -> (i32, i32) {
    %c0_i32 = arith.constant 0 : i32
    %c0_i32_0 = arith.constant 0 : i32
    return %arg0, %c0_i32 : i32, i32
  }
  func.func @transform_1(%arg0: i32) -> (i32, i32) {
    %c0_i32 = arith.constant 0 : i32
    %c0_i32_0 = arith.constant 0 : i32
    %c0_i32_1 = arith.constant 0 : i32
    return %c0_i32, %c0_i32_0 : i32, i32
  }
  func.func @transform_2(%arg0: i32) -> (i32, i32) {
    %c0_i32 = arith.constant 0 : i32
    %c0_i32_0 = arith.constant 0 : i32
    %c0_i32_1 = arith.constant 0 : i32
    return %c0_i32, %c0_i32_0 : i32, i32
  }
  func.func @transform_3(%arg0: i32) -> (i32, i32) {
    %c0_i32 = arith.constant 0 : i32
    %c0_i32_0 = arith.constant 0 : i32
    return %arg0, %c0_i32 : i32, i32
  }
}

</mosaic_0001>

<bundles_post_ra>
// kernel: tpu_custom_call.1
= control target key start
LH: loop header
LB: loop body
LE: loop exit
PB: predicated region body
PF: predicated region fallthrough
CT: control target
= control target key end

     0   :  { %8 = vsyncpa [#allocation3], 0  ;;  %s593_s0 = inlined_call_operand.hbm [shape: f32[8,105], index: 0, kind: input, shape index: {}]   ;;  %s594_s1 = inlined_call_operand.hbm [shape: bf16[384,128], index: 1, kind: input, shape index: {}]   ;;  %s595_s2 = inlined_call_operand.hbm [shape: f32[8,128], index: 2, kind: input, shape index: {}]   ;;  %s596_s3 = inlined_call_operand.hbm [shape: f32[8,128], index: 3, kind: output, shape index: {}]  }
   0x1   :  { %9 = vsyncpa [#allocation6], 0  ;;  %s26_s14 = sshll.u32 %s594_s1, 4  ;;  %s27_s14 = int_to_ptr.hbm [resolvable:$true] %s26_s14 }
   0x2   :  { %10 = vsyncpa [#allocation4], 0  ;;  %s555_s15 = smov [#allocation5]   ;;  %s16_s19 = sshll.u32 %s593_s0, 4  ;;  %s17_s19 = int_to_ptr.hbm [resolvable:$true] %s16_s19 }
   0x3   :  { %s28_s16 = sshll.u32 %s555_s15, 4  ;;  %s556_s20 = smov 64   ;;  %s29_s16 = int_to_ptr.vmem [resolvable:$true] %s28_s16 }
   0x4   :  { %s557_s21 = smov 4   ;;  %s558_s22 = smov [#allocation2]  }
   0x5   :  { %34 = dma.hbm_to_vmem [thread:$0]  %s27_s14, 3072, %s29_s16, [#allocation6], %s556_s20, %s556_s20, %s557_s21  }
   0x6   :  { %s18_s23 = sshll.u32 %s558_s22, 4  ;;  %s40_s26 = sshll.u32 %s595_s2, 4  ;;  %s19_s23 = int_to_ptr.vmem [resolvable:$true] %s18_s23  ;;  %s41_s26 = int_to_ptr.hbm [resolvable:$true] %s40_s26 }
   0x7   :  { %21 = dma.hbm_to_vmem [thread:$0]  %s17_s19, 128, %s19_s23, [#allocation3]  }
   0x8   :  { %s559_s1 = smov [#allocation7]  }
   0x9   :  { %s42_s27 = sshll.u32 %s559_s1, 4  ;;  %s43_s27 = int_to_ptr.vmem [resolvable:$true] %s42_s27 }
   0xa   :  { %45 = dma.hbm_to_vmem [thread:$0]  %s41_s26, 128, %s43_s27, [#allocation6]  }
   0xb   :  { %549 = dma.done.wait [#allocation3], 128  }
   0xc   :  { %550 = vsyncadd [#allocation3], 4294967168 }
   0xd   :  { %551 = dma.done.wait [#allocation6], 3200  }
   0xe   :  { %552 = vsyncadd [#allocation6], 4294964096  ;;  %v426_v0 = vld [vmem:[#allocation5 + $0x38] sm:$0xff]  ;;  %v425_v1 = vld [vmem:[#allocation5 + $0x30] sm:$0xff]  ;;  %vm59_vm0 = vcmask 859136   ;;  %s560_s0 = smov [#allocation8]  }
   0xf   :  { %160 = vmatpush.bf16.msra.mxu0 %v426_v0  ;;  %v434_v2 = vld [vmem:[#allocation5 + $0x78] sm:$0xff]  ;;  %v433_v3 = vld [vmem:[#allocation5 + $0x70] sm:$0xff]  ;;  %v424_v4 = vld [vmem:[#allocation5 + $0x28] sm:$0xff]  ;;  %s307_s2 = sshll.u32 %s560_s0, 4  ;;  %s309_s30 = sshll.u32 %s596_s3, 4  ;;  %s308_s2 = int_to_ptr.vmem [resolvable:$true] %s307_s2  ;;  %s310_s30 = int_to_ptr.hbm [resolvable:$true] %s309_s30 }
  0x10   :  { %224 = vmatpush.bf16.msra.mxu1 %v434_v2  ;;  %v432_v5 = vld [vmem:[#allocation5 + $0x68] sm:$0xff]  ;;  %v423_v6 = vld [vmem:[#allocation5 + $0x20] sm:$0xff]  ;;  %v422_v8 = vld [vmem:[#allocation5 + $0x18] sm:$0xff] }
  0x11   :  { %v431_v7 = vld [vmem:[#allocation5 + $0x60] sm:$0xff]  ;;  %v430_v9 = vld [vmem:[#allocation5 + $0x58] sm:$0xff]  ;;  %v421_v10 = vld [vmem:[#allocation5 + $0x10] sm:$0xff] }
  0x12   :  { %v420_v11 = vld [vmem:[#allocation5 + $0x8] sm:$0xff]  ;;  %v419_v12 = vld [vmem:[#allocation5] sm:$0xff]  ;;  %v58_v13 = vld [vmem:[#allocation2] sm:$0xff] }
  0x13   :  { %161 = vmatpush.bf16.msra.mxu0 %v425_v1  ;;  %v353_v14 = vpack.c.bf16 %v58_v13, %v58_v13  ;;  %vm352_vm1 = vmpackc.low %vm59_vm0, %vm59_vm0  ;;  %v429_v15 = vld [vmem:[#allocation5 + $0x50] sm:$0xff]  ;;  %v428_v16 = vld [vmem:[#allocation5 + $0x48] sm:$0xff] }
  0x14   :  { %225 = vmatpush.bf16.msra.mxu1 %v433_v3  ;;  %v427_v17 = vld [vmem:[#allocation5 + $0x40] sm:$0xff]  ;;  %v442_v18 = vld [vmem:[#allocation5 + $0xb8] sm:$0xff]  ;;  %v441_v19 = vld [vmem:[#allocation5 + $0xb0] sm:$0xff] }
  0x15   :  { %288 = vmatpush.bf16.msra.mxu2 %v442_v18  ;;  %v440_v20 = vld [vmem:[#allocation5 + $0xa8] sm:$0xff]  ;;  %v439_v21 = vld [vmem:[#allocation5 + $0xa0] sm:$0xff]  ;;  %v438_v23 = vld [vmem:[#allocation5 + $0x98] sm:$0xff] }
  0x16   :  { %v109_v22 = vld [vmem:[#allocation7] sm:$0xff]  ;;  %v437_v30 = vld [vmem:[#allocation5 + $0x90] sm:$0xff]  ;;  %v436_v31 = vld [vmem:[#allocation5 + $0x88] sm:$0xff] }
  0x17   :  { %162 = vmatpush.bf16.msra.mxu0 %v424_v4  ;;  %v111_v24 = vperm.slane %v109_v22, 0  ;;  %v435_v32 = vld [vmem:[#allocation5 + $0x80] sm:$0xff]  ;;  %v175_v33 = vperm.slane %v109_v22, 1  ;;  %v239_v39 = vperm.slane %v109_v22, 2 }
  0x18   :  { %226 = vmatpush.bf16.msra.mxu1 %v432_v5 }
  0x19   :  { %289 = vmatpush.bf16.msra.mxu2 %v441_v19 }
  0x1b   :  { %163 = vmatpush.bf16.msra.mxu0 %v423_v6 }
  0x1c   :  { %227 = vmatpush.bf16.msra.mxu1 %v431_v7 }
  0x1d   :  { %290 = vmatpush.bf16.msra.mxu2 %v440_v20 }
  0x1f   :  { %164 = vmatpush.bf16.msra.mxu0 %v422_v8 }
  0x20   :  { %228 = vmatpush.bf16.msra.mxu1 %v430_v9 }
  0x21   :  { %291 = vmatpush.bf16.msra.mxu2 %v439_v21 }
  0x23   :  { %165 = vmatpush.bf16.msra.mxu0 %v421_v10 }
  0x24   :  { %229 = vmatpush.bf16.msra.mxu1 %v429_v15 }
  0x25   :  { %292 = vmatpush.bf16.msra.mxu2 %v438_v23 }
  0x27   :  { %166 = vmatpush.bf16.msra.mxu0 %v420_v11 }
  0x28   :  { %230 = vmatpush.bf16.msra.mxu1 %v428_v16 }
  0x29   :  { %293 = vmatpush.bf16.msra.mxu2 %v437_v30 }
  0x2b   :  { %167 = vmatpush.bf16.msra.mxu0 %v419_v12 }
  0x2c   :  { %231 = vmatpush.bf16.msra.mxu1 %v427_v17 }
  0x2d   :  { %294 = vmatpush.bf16.msra.mxu2 %v436_v31 }
  0x2e   :  { %354 = vmatmul.msk.bf16.vlgmr.msra.gmra.mxu0 %vm352_vm1, %v353_v14 }
  0x31   :  { %295 = vmatpush.bf16.msra.mxu2 %v435_v32 }
  0xab   :  { %v169_v25 = vpop.f32.mrf.mxu0 }
  0xac   :  { %v170_v26 = vadd.f32 %v169_v25, %v111_v24 }
  0xae   :  { %449 = vtanh.f32 %v170_v26 }
  0xb3   :  { %v171_v27 = vpop.f32.mrf.mxu0 }
  0xb4   :  { %v450_v28 = vpop.eup %449 }
  0xb5   :  { %v174_v29 = vpack.c.bf16 %v450_v28, %v450_v28 }
  0xb7   :  { %232 = vmatmul.bf16.vlgmr.msra.gmra.mxu1 %v174_v29 }
 0x134   :  { %v233_v34 = vpop.f32.mrf.mxu1 }
 0x135   :  { %v234_v35 = vadd.f32 %v233_v34, %v175_v33 }
 0x137   :  { %451 = vtanh.f32 %v234_v35 }
 0x13c   :  { %v235_v36 = vpop.f32.mrf.mxu1 }
 0x13d   :  { %v452_v37 = vpop.eup %451 }
 0x13e   :  { %v238_v38 = vpack.c.bf16 %v452_v37, %v452_v37 }
 0x140   :  { %296 = vmatmul.bf16.vlgmr.msra.gmra.mxu2 %v238_v38 }
 0x1c3   :  { %v297_v40 = vpop.f32.mrf.mxu2 }
 0x1c4   :  { %v298_v41 = vadd.f32 %v297_v40, %v239_v39 }
 0x1c6   :  { %301 = vst [vmem:[#allocation8] sm:$0xff] %v298_v41 }
 0x1c7   :  { %312 = dma.vmem_to_hbm [thread:$0]  %s308_s2, 128, %s310_s30, [#allocation4]  }
 0x1cb   :  { %v299_v42 = vpop.f32.mrf.mxu2 }
 0x1cc   :  { %553 = dma.done.wait [#allocation4], 128  }
 0x1cd   :  { %554 = vsyncadd [#allocation4], 4294967168 }
 0x1ce   :  { %317 = vsyncpa [#allocation3], 1 }
 0x1cf   :  { %318 = vsyncpa [#allocation6], 1 }
 0x1d0   :  { %319 = vsyncpa [#allocation4], 1 }

</bundles_post_ra>
